<compile_context>
chip_gen: v6e
topology: v6e:2x2x1
jax: 0.10.0
libtpu: 0.0.40
codegen_flags: <defaults>
</compile_context>

<pallas_src>
import functools

import jax
import jax.numpy as jnp
from jax.experimental import pallas as pl
from jax.experimental.pallas import tpu as pltpu


# ---------------------------------------------------------------------------
# Phase 1: global average pool (spatial sum per (batch, channel)).
# ---------------------------------------------------------------------------
def _pool_kernel(x_ref, sum_ref):
    # x_ref:   (C, TS)  one spatial tile of one batch element
    # sum_ref: (C, 1)   f32 accumulator, resident across the spatial grid axis
    @pl.when(pl.program_id(1) == 0)
    def _():
        sum_ref[...] = jnp.zeros_like(sum_ref)

    # f32-accumulated last-axis (lane) reduction; for f32 inputs the cast is a
    # no-op, for bf16 it only widens this small tile, not the whole slab.
    sum_ref[...] += jnp.sum(x_ref[...].astype(jnp.float32), axis=1, keepdims=True)


# ---------------------------------------------------------------------------
# Phase 2: squeeze-excitation MLP on the pooled means, batched with M = B.
# ---------------------------------------------------------------------------
def _gate_kernel(sum_ref, w1t_ref, w2t_ref, gate_ref, *, inv_s):
    mean = sum_ref[...] * inv_s                                          # (B, C) f32
    h = jnp.dot(mean, w1t_ref[...], preferred_element_type=jnp.float32)  # (B, Cr)
    h = jnp.maximum(h, 0.0)                                              # ReLU
    g = jnp.dot(h, w2t_ref[...], preferred_element_type=jnp.float32)     # (B, C)
    gate_ref[...] = jax.nn.sigmoid(g)


# ---------------------------------------------------------------------------
# Phase 3: elementwise scale x * gate[b, c]  (pure HBM-bandwidth pass).
# ---------------------------------------------------------------------------
def _scale_kernel(x_ref, g_ref, o_ref):
    # x_ref/o_ref: (C, TS); g_ref: (C, 1) broadcast along lanes.
    # Multiply in the native dtype: no full-tile f32 copy.
    o_ref[...] = x_ref[...] * g_ref[...].astype(o_ref.dtype)


def _choose_spatial_tile(S, C, itemsize, target_block_bytes=2 * 1024 * 1024):
    """Largest spatial tile TS with C*TS*itemsize <= target and TS | S.

    Prefers TS that is a multiple of 128 (lane-dense, unmasked stores). The
    ~2 MiB cap keeps input+output double buffers well under v7x's 32 MiB
    scoped VMEM (and v5e's 16 MiB default)."""
    max_ts = max(1, target_block_bytes // max(1, C * itemsize))
    if S <= max_ts:
        return S
    start = (max_ts // 128) * 128
    for ts in range(start, 0, -128):
        if S % ts == 0:
            return ts
    for ts in range(int(max_ts), 0, -1):
        if S % ts == 0:
            return ts
    return S


def channel_attention(x_ncdhw, w1, w2):
    """x: (B, C, D, H, W); w1: (Cr, C), w2: (C, Cr) = PyTorch Linear weights (bias=False)."""
    B, C, D, H, W = x_ncdhw.shape
    S = D * H * W
    Cr = w1.shape[0]
    itemsize = x_ncdhw.dtype.itemsize

    # Free, contiguous view -- no transpose passes over HBM.
    x_bcs = x_ncdhw.reshape(B, C, S)

    TS = _choose_spatial_tile(S, C, itemsize)
    n_s = S // TS

    # ---- Phase 1: per-(b, c) spatial sums ---------------------------------
    sums = pl.pallas_call(
        _pool_kernel,
        out_shape=jax.ShapeDtypeStruct((B, C, 1), jnp.float32),
        grid_spec=pltpu.PrefetchScalarGridSpec(
            num_scalar_prefetch=0,
            grid=(B, n_s),
            in_specs=[pl.BlockSpec((pl.Squeezed(), C, TS), lambda b, s: (b, 0, s))],
            out_specs=pl.BlockSpec((pl.Squeezed(), C, 1), lambda b, s: (b, 0, 0)),
        ),
        compiler_params=pltpu.CompilerParams(
            dimension_semantics=("parallel", "arbitrary"),
            vmem_limit_bytes=32 * 1024 * 1024,
        ),
        cost_estimate=pl.CostEstimate(
            flops=B * C * S,
            transcendentals=0,
            bytes_accessed=B * C * S * itemsize + B * C * 4,
        ),
    )(x_bcs)

    # ---- Phase 2: gate = sigmoid(relu(mean @ W1^T) @ W2^T), done once ------
    w1t = jnp.transpose(w1).astype(jnp.float32)  # (C, Cr)
    w2t = jnp.transpose(w2).astype(jnp.float32)  # (Cr, C)
    gate = pl.pallas_call(
        functools.partial(_gate_kernel, inv_s=1.0 / float(S)),
        out_shape=jax.ShapeDtypeStruct((B, C), jnp.float32),
        in_specs=[
            pl.BlockSpec((B, C), lambda: (0, 0)),
            pl.BlockSpec((C, Cr), lambda: (0, 0)),
            pl.BlockSpec((Cr, C), lambda: (0, 0)),
        ],
        out_specs=pl.BlockSpec((B, C), lambda: (0, 0)),
    )(sums.reshape(B, C), w1t, w2t)

    # ---- Phase 3: elementwise scale ----------------------------------------
    out_bcs = pl.pallas_call(
        _scale_kernel,
        out_shape=jax.ShapeDtypeStruct((B, C, S), x_ncdhw.dtype),
        grid_spec=pltpu.PrefetchScalarGridSpec(
            num_scalar_prefetch=0,
            grid=(B, n_s),
            in_specs=[
                pl.BlockSpec((pl.Squeezed(), C, TS), lambda b, s: (b, 0, s)),
                pl.BlockSpec((pl.Squeezed(), C, 1), lambda b, s: (b, 0, 0)),
            ],
            out_specs=pl.BlockSpec((pl.Squeezed(), C, TS), lambda b, s: (b, 0, s)),
        ),
        compiler_params=pltpu.CompilerParams(
            dimension_semantics=("parallel", "parallel"),
            vmem_limit_bytes=32 * 1024 * 1024,
        ),
        cost_estimate=pl.CostEstimate(
            flops=B * C * S,
            transcendentals=0,
            bytes_accessed=2 * B * C * S * itemsize + B * C * 4,
        ),
    )(x_bcs, gate.reshape(B, C, 1))

    return out_bcs.reshape(B, C, D, H, W)


def channel_attention_ref(x, w1, w2):
    """Pure-JAX reference matching the PyTorch forward (bias=False Linears)."""
    y = jnp.mean(x, axis=(2, 3, 4))                  # (B, C)
    y = jnp.maximum(y @ w1.T, 0.0)                   # (B, Cr)
    y = jax.nn.sigmoid(y @ w2.T)                     # (B, C)
    return x * y[:, :, None, None, None]


if __name__ == "__main__":
    # Small shapes consistent with the module: channel divisible by reduction.
    B, C, D, H, W = 2, 32, 4, 8, 8
    reduction = 4
    Cr = C // reduction

    key = jax.random.PRNGKey(0)
    kx, k1, k2 = jax.random.split(key, 3)
    x = jax.random.normal(kx, (B, C, D, H, W), dtype=jnp.float32)
    # PyTorch Linear weight shapes; both Linears have bias=False in the module.
    w1 = jax.random.normal(k1, (Cr, C), dtype=jnp.float32) * 0.1  # Linear(C, Cr)
    w2 = jax.random.normal(k2, (C, Cr), dtype=jnp.float32) * 0.1  # Linear(Cr, C)

    out = channel_attention(x, w1, w2)
    out = jax.block_until_ready(out)

    ref = channel_attention_ref(x, w1, w2)
    assert out.shape == x.shape
    assert jnp.allclose(out, ref, atol=1e-5, rtol=1e-5)

    print("KERNEL_OK")
</pallas_src>

<mosaic_0001>
module attributes {stable_mosaic.version = 11 : i64} {
  func.func @_pool_kernel(%arg0: i32, %arg1: i32, %arg2: memref<1x32x256xf32, #tpu.memory_space<vmem>>, %arg3: memref<1x32x1xf32, #tpu.memory_space<vmem>>) attributes {dimension_semantics = [#tpu.dimension_semantics<parallel>, #tpu.dimension_semantics<arbitrary>], iteration_bounds = array<i64: 2, 1>, scalar_prefetch = 0 : i64, scratch_operands = 0 : i64, tpu.core_type = #tpu.core_type<tc>, window_params = [{transform_indices = @transform_0, window_bounds = array<i64: 1, 32, 256>}, {transform_indices = @transform_1, window_bounds = array<i64: 1, 32, 1>}]} {
    %c0_i32 = arith.constant 0 : i32
    %0 = arith.cmpi eq, %arg1, %c0_i32 : i32
    %1 = arith.extui %0 : i1 to i32
    %c0_i32_0 = arith.constant 0 : i32
    %2 = arith.cmpi ne, %1, %c0_i32_0 : i32
    scf.if %2 {
      %cst_9 = arith.constant 0.000000e+00 : f32
      %13 = vector.broadcast %cst_9 : f32 to vector<32x1xf32>
      %c0_10 = arith.constant 0 : index
      %c0_11 = arith.constant 0 : index
      %c0_12 = arith.constant 0 : index
      %14 = vector.load %arg3[%c0_10, %c0_11, %c0_12] : memref<1x32x1xf32, #tpu.memory_space<vmem>>, vector<1x32x1xf32>
      %15 = vector.shape_cast %14 : vector<1x32x1xf32> to vector<32x1xf32>
      %16 = vector.shape_cast %13 : vector<32x1xf32> to vector<1x32x1xf32>
      tpu.vector_store %arg3[%c0_10, %c0_11, %c0_12], %16 {strides = array<i32>} : memref<1x32x1xf32, #tpu.memory_space<vmem>>, vector<1x32x1xf32>,
    } else {
    }
    %c0 = arith.constant 0 : index
    %c0_1 = arith.constant 0 : index
    %c0_2 = arith.constant 0 : index
    %3 = vector.load %arg3[%c0, %c0_1, %c0_2] : memref<1x32x1xf32, #tpu.memory_space<vmem>>, vector<1x32x1xf32>
    %4 = vector.shape_cast %3 : vector<1x32x1xf32> to vector<32x1xf32>
    %c0_3 = arith.constant 0 : index
    %c0_4 = arith.constant 0 : index
    %c0_5 = arith.constant 0 : index
    %5 = vector.load %arg2[%c0_3, %c0_4, %c0_5] : memref<1x32x256xf32, #tpu.memory_space<vmem>>, vector<1x32x256xf32>
    %6 = vector.shape_cast %5 : vector<1x32x256xf32> to vector<32x256xf32>
    %cst = arith.constant dense<0.000000e+00> : vector<32xf32>
    %7 = vector.multi_reduction <add>, %6, %cst [1] : vector<32x256xf32> to vector<32xf32>
    %8 = vector.shape_cast %7 : vector<32xf32> to vector<32x1xf32>
    %9 = arith.addf %4, %8 : vector<32x1xf32>
    %c0_6 = arith.constant 0 : index
    %c0_7 = arith.constant 0 : index
    %c0_8 = arith.constant 0 : index
    %10 = vector.load %arg3[%c0_6, %c0_7, %c0_8] : memref<1x32x1xf32, #tpu.memory_space<vmem>>, vector<1x32x1xf32>
    %11 = vector.shape_cast %10 : vector<1x32x1xf32> to vector<32x1xf32>
    %12 = vector.shape_cast %9 : vector<32x1xf32> to vector<1x32x1xf32>
    tpu.vector_store %arg3[%c0_6, %c0_7, %c0_8], %12 {strides = array<i32>} : memref<1x32x1xf32, #tpu.memory_space<vmem>>, vector<1x32x1xf32>,
    return
  }
  func.func @transform_0(%arg0: i32, %arg1: i32) -> (i32, i32, i32) {
    %c0_i32 = arith.constant 0 : i32
    %c0_i32_0 = arith.constant 0 : i32
    return %arg0, %c0_i32, %arg1 : i32, i32, i32
  }
  func.func @transform_1(%arg0: i32, %arg1: i32) -> (i32, i32, i32) {
    %c0_i32 = arith.constant 0 : i32
    %c0_i32_0 = arith.constant 0 : i32
    %c0_i32_1 = arith.constant 0 : i32
    return %arg0, %c0_i32, %c0_i32_0 : i32, i32, i32
  }
}

</mosaic_0001>

<bundles_post_ra>
// kernel: tpu_custom_call.1
= control target key start
LH: loop header
LB: loop body
LE: loop exit
PB: predicated region body
PF: predicated region fallthrough
CT: control target
= control target key end

     0   :  { %6 = vsyncpa [#allocation3], 0  ;;  %s559_s0 = inlined_call_operand.hbm [shape: f32[2,32,256], index: 0, kind: input, shape index: {}]   ;;  %s560_s1 = inlined_call_operand.vmem [shape: f32[2,32,1], index: 1, kind: output, shape index: {}]  }
   0x1   :  { %8 = vsyncpa [#allocation3 + $0x1], 0  ;;  %s441_s6 = smov 0   ;;  %s443_s7 = smov 0  }
   0x2   :  { %s445_s8 = smov 0   ;;  %s447_s9 = smov 0  }
   0x3   :  { %s449_s10 = smov 0   ;;  %s451_s11 = smov 0  }
   0x4 LB: > { %s274_s12 = sadd.s32 4294967295, %s425_s11   ;;  %s26_s13 = sadd.s32 1, %s421_s10  ;;  %s425_s11 = sphi %s451_s11, %s14_s11   ;;  %s421_s10 = sphi %s449_s10, %s568_s10   ;;  %s417_s9 = sphi %s447_s9, %s567_s9   ;;  %s413_s8 = sphi %s445_s8, %s566_s8   ;;  %s409_s7 = sphi %s443_s7, %s565_s7   ;;  %s405_s6 = sphi %s441_s6, %s564_s6  }
   0x5   : > { %p28_p0 = scmp.ge.s32.totalorder %s26_s13, 2  ;;  %s35_s14 = sadd.s32 1, %s413_s8 }
   0x6   : > { %p42_p1 = scmp.ne.s32.totalorder %s413_s8, %s409_s7  ;;  %p43_p2 = scmp.eq.s32.totalorder %s425_s11, 0 }
   0x7   : > { %s570_s13 = smov (%p28_p0, %s26_s13), 0  ;;  %p48_p4 = scmp.ne.s32.totalorder %s409_s7, %s405_s6 }
   0x8   : > { %p477_p3 = por %p43_p2, %p42_p1  ;;  %s30_s16 = ssub.s32 %s421_s10, %s570_s13 }
   0x9   : > { %p49_p5 = scmp.eq.s32.totalorder %s274_s12, 0  ;;  %p33_p6 = scmp.eq.s32.totalorder %s30_s16, 0 }
   0xa   : > { %p295_p8 = scmp.lt.s32.totalorder %s425_s11, 2  ;;  %s98_s19 = sand.u32 1, %s413_s8  }
   0xb   : > { %p484_p7 = por %p49_p5, %p48_p4  ;;  %s287_s20 = sshll.u32 %s421_s10, 10 }
   0xc   : > { %s490_s18 = scalar_select %p33_p6, %s413_s8, %s35_s14  }
   0xd   : > { %s278_s21 = sshll.u32 %s98_s19, 6  ;;  %s110_s24 = scalar_lea.hbm %s559_s0, %s287_s20 }
   0xe   : > { %s102_s25 = scalar_lea.vmem [#allocation2], %s278_s21  ;;  %p499_p9 = pnand %p295_p8, %p477_p3 }
   0xf   : > { %s111_s26 = sshll.u32 %s102_s25, 4  ;;  %s99_s28 = scalar_lea.sflag [#allocation3], %s98_s19  ;;  %s112_s26 = int_to_ptr.vmem [resolvable:$true] %s111_s26 }
  0x10   : > { %p349_p10 = pneg %p499_p9  ;;  %s360_s29 = scalar_lea.vmem %s112_s26, 1024 }
  0x11   : > { %p361_p11 = scmp.ne.s32.totalorder %s112_s26, %s360_s29  ;;  %s427_s30 = smov [#allocation2]  }
  0x12   : > { %s365_s2 = sshll.u32 %s427_s30, 4  ;;  %s366_s2 = int_to_ptr.vmem [resolvable:$false] %s365_s2 }
  0x13   : > { %p363_p12 = pnand %p361_p11, %p349_p10  ;;  %s367_s3 = scalar_lea.vmem %s366_s2, 2048 }
  0x14   : > { %p368_p0 = scmp.lt.s32.totalorder %s112_s26, %s366_s2  ;;  %p369_p1 = scmp.lt.s32.totalorder %s367_s3, %s360_s29 }
  0x15   : > { %p364_p13 = pneg %p363_p12 }
  0x16   : > { %p370_p2 = por %p369_p1, %p368_p0 }
  0x18   : > { %p371_p3 = pnand %p370_p2, %p364_p13 }
  0x1a   : > { %374 = shalt.err (!%p371_p3)
}
  0x1b   : > { %s428_s4 = smov 256   ;;  %s429_s5 = smov 16  }
  0x1c   : > { %294 = dma.hbm_to_vmem [thread:$0]  (!%p499_p9), %s110_s24, 1024, %s112_s26, %s99_s28, %s428_s4, %s428_s4, %s429_s5  }
  0x1d   : > { %p281_p4 = scmp.ge.s32.totalorder %s425_s11, 1  ;;  %p119_p5 = scmp.lt.s32.totalorder %s425_s11, 3 }
  0x1f   : > { %p120_p6 = pnand %p281_p4, %p119_p5 }
  0x20   : > { %s125_s6 = sand.u32 (!%p120_p6), 1, %s409_s7  }
  0x21   : > { %123 = sbr.rel (%p120_p6) target bundleno = 188 (0xbc), region = 24  ;;  %s282_s12 = sshll.u32 (!%p120_p6), %s125_s6, 6 }
  0x22   : > { %s126_s14 = scalar_lea.sflag (!%p120_p6), [#allocation3], %s125_s6  ;;  %s129_s15 = scalar_lea.vmem (!%p120_p6), [#allocation2], %s282_s12 }
  0x26   : > { %400 = dma.done.wait (%p484_p7), %s126_s14, 1024  }
  0x27   : > { %402 = vsyncadd (%p484_p7), %s126_s14, 4294966272  ;;  %p149_p8 = scmp.lt.s32.totalorder %s417_s9, 1  ;;  %vm158_vm0 = vcmask 7168   ;;  %v430_v0 = vmov 0.0   ;;  %v171_v1 = vld [vmem:[%s129_s15 + $0x20] sm:$0xff]  ;;  %v172_v2 = vld [vmem:[%s129_s15 + $0x28] sm:$0xff] }
  0x28   : > { %v167_v3 = vld [vmem:[%s129_s15] sm:$0xff]  ;;  %v181_v4 = vadd.f32 %v172_v2, %v171_v1  ;;  %v168_v5 = vld [vmem:[%s129_s15 + $0x8] sm:$0xff]  ;;  %v173_v6 = vld [vmem:[%s129_s15 + $0x30] sm:$0xff] }
  0x29   : > { %s572_s9 = smov (!%p149_p8, %s417_s9), 1  ;;  %v174_v7 = vld [vmem:[%s129_s15 + $0x38] sm:$0xff]  ;;  %v175_v8 = vadd.f32 %v168_v5, %v167_v3  ;;  %v169_v9 = vld [vmem:[%s129_s15 + $0x10] sm:$0xff] }
  0x2a   : > { %s288_s16 = sshll.u32 %s572_s9, 5  ;;  %v170_v10 = vld [vmem:[%s129_s15 + $0x18] sm:$0xff]  ;;  %182 = vadd.xlane.f32.xlu1 %v181_v4  ;;  %v184_v11 = vadd.f32 %v174_v7, %v173_v6 }
  0x2b   : > { %s519_s21 = scalar_lea.vmem %s560_s1, %s288_s16  ;;  %176 = vadd.xlane.f32.xlu0 %v175_v8  ;;  %v178_v12 = vadd.f32 %v170_v10, %v169_v9 }
  0x2c   : > { %161 = vst.msk [vmem:[%s519_s21 + $0x10] sm:$0xff] %vm158_vm0, %v430_v0  ;;  %159 = vst.msk [vmem:[%s519_s21] sm:$0xff] %vm158_vm0, %v430_v0 }
  0x2d   : > { %160 = vst.msk [vmem:[%s519_s21 + $0x8] sm:$0xff] %vm158_vm0, %v430_v0  ;;  %162 = vst.msk [vmem:[%s519_s21 + $0x18] sm:$0xff] %vm158_vm0, %v430_v0 }
  0x2e   : > { %185 = vadd.xlane.f32.xlu1 %v184_v11 }
  0x2f   : > { %179 = vadd.xlane.f32.xlu0 %v178_v12 }
  0x33   : > { %v165_v13 = vld [vmem:[%s519_s21 + $0x10] sm:$0xff]  ;;  %v163_v14 = vld [vmem:[%s519_s21] sm:$0xff] }
  0x34   : > { %v166_v19 = vld [vmem:[%s519_s21 + $0x18] sm:$0xff]  ;;  %v164_v20 = vld [vmem:[%s519_s21 + $0x8] sm:$0xff] }
  0xb3   : > { %v183_v15 = vpop.xlane.xlu1 %182 }
  0xb4   : > { %v189_v16 = vadd.f32 %v183_v15, %v165_v13  ;;  %v177_v17 = vpop.xlane.xlu0 %176 }
  0xb5   : > { %v187_v18 = vadd.f32 %v177_v17, %v163_v14 }
  0xb6   : > { %194 = vst.msk [vmem:[%s519_s21 + $0x10] sm:$0xff] %vm158_vm0, %v189_v16 }
  0xb7   : > { %192 = vst.msk [vmem:[%s519_s21] sm:$0xff] %vm158_vm0, %v187_v18  ;;  %v186_v21 = vpop.xlane.xlu1 %185 }
  0xb8   : > { %v190_v22 = vadd.f32 %v186_v21, %v166_v19  ;;  %v180_v23 = vpop.xlane.xlu0 %179 }
  0xb9   : > { %v188_v24 = vadd.f32 %v180_v23, %v164_v20 }
  0xba   : > { %195 = vst.msk [vmem:[%s519_s21 + $0x18] sm:$0xff] %vm158_vm0, %v190_v22 }
  0xbb   : > { %193 = vst.msk [vmem:[%s519_s21 + $0x8] sm:$0xff] %vm158_vm0, %v188_v24 }
  0xbc PF: > { %s14_s11 = sadd.s32 1, %s425_s11   ;;  %s564_s6 = smov %s409_s7 }
  0xbd   : > { %p11_p7 = scmp.ge.s32.totalorder %s14_s11, 4   ;;  %s565_s7 = smov %s413_s8 }
  0xbe   : > { %s566_s8 = smov %s490_s18  ;;  %s567_s9 = smov %s421_s10 }
  0xbf   : > { %s568_s10 = smov %s570_s13  ;;  %13 = sbr.rel (!%p11_p7) target bundleno = 4 (0x4), region = 68 }
  0xc4   :  { %217 = vsyncpa [#allocation3], 1 }
  0xc5   :  { %219 = vsyncpa [#allocation3 + $0x1], 1 }

</bundles_post_ra>
